<compile_context>
chip_gen: v7x
topology: tpu7x:2x2x1
jax: 0.10.0
libtpu: 0.0.40
codegen_flags: <defaults>
</compile_context>

<pallas_src>
import functools
import math

import jax
import jax.numpy as jnp
from jax import lax
from jax.experimental import pallas as pl
from jax.experimental.pallas import tpu as pltpu


def _pick_tile(n, cap):
    """Largest power-of-two tile <= cap that divides n (falls back to n)."""
    for t in (512, 256, 128, 64, 32, 16, 8):
        if t <= cap and t <= n and n % t == 0:
            return t
    return n


# ---------------------------------------------------------------------------
# Kernel A: input projections (wide matmuls, head-major q/k/v, bf16 gate g).
# ---------------------------------------------------------------------------
def _proj_kernel(x_ref, wq_ref, wk_ref, wv_ref, wg_ref,
                 q_ref, k_ref, v_ref, g_ref, *, num_heads, key_dim, head_dim):
    x = x_ref[0]                                                    # (TM, E) bf16
    # One full-width matmul per projection keeps MXU columns saturated.
    q = jnp.dot(x, wq_ref[...], preferred_element_type=jnp.float32)   # (TM, E)
    k = jnp.dot(x, wk_ref[...], preferred_element_type=jnp.float32)   # (TM, E)
    v = jnp.dot(x, wv_ref[...], preferred_element_type=jnp.float32)   # (TM, V)
    g = jnp.dot(x, wg_ref[...], preferred_element_type=jnp.float32)   # (TM, V)
    for h in range(num_heads):                                       # static unroll
        q_ref[0, h] = q[:, h * key_dim:(h + 1) * key_dim].astype(q_ref.dtype)
        k_ref[0, h] = k[:, h * key_dim:(h + 1) * key_dim].astype(k_ref.dtype)
        v_ref[0, h] = v[:, h * head_dim:(h + 1) * head_dim].astype(v_ref.dtype)
    g_ref[0] = g.astype(g_ref.dtype)


# ---------------------------------------------------------------------------
# Kernel B: tiled retention + group-norm + gate + output projection.
# ---------------------------------------------------------------------------
def _retention_kernel(qh_ref, kh_ref, vh_ref, g_ref, wo_ref, o_ref,
                      num_acc, den_acc, out_buf, *, decay, tq, tk, head_dim, eps):
    qi = pl.program_id(1)
    ki = pl.program_id(2)
    nk = pl.num_programs(2)
    num_heads = len(decay)

    @pl.when(ki == 0)
    def _():
        num_acc[...] = jnp.zeros_like(num_acc)
        den_acc[...] = jnp.zeros_like(den_acc)

    def accumulate(on_diagonal):
        q_off = (qi * tq).astype(jnp.float32)
        k_off = (ki * tk).astype(jnp.float32)
        r = lax.broadcasted_iota(jnp.float32, (tq, 1), 0)            # local rows
        c = lax.broadcasted_iota(jnp.float32, (1, tk), 1)            # local cols
        # tq == tk, so the only diagonal-crossing tile has q_off == k_off:
        # the causal predicate reduces to the purely local r >= c.
        causal = (r >= c) if on_diagonal else None

        for h, dh in enumerate(decay):                               # static unroll
            one_minus_gamma = -math.expm1(dh)                        # = 1 - gamma
            # 1/sqrt(sum_{d<=i} gamma^d); -expm1 avoids cancellation near gamma~1.
            inv_norm = lax.rsqrt(
                -jnp.expm1(dh * (r + q_off + 1.0)) / one_minus_gamma)   # (tq, 1)
            # Rank-1 factorization of the decay mask:
            #   gamma^(i-j) = exp(dh*(r + q_off - k_off)) * exp(-dh*c)
            row_scale = jnp.exp(dh * (r + (q_off - k_off))) * inv_norm  # (tq, 1)
            col_scale = jnp.exp(-dh * c)                                # (1, tk)

            q_h = qh_ref[0, h]                                       # (tq, Dk) bf16
            k_h = kh_ref[0, h]                                       # (tk, Dk) bf16
            v_h = vh_ref[0, h]                                       # (tk, Dv) bf16

            # Contract on last axes: no explicit transpose of k.
            s = lax.dot_general(q_h, k_h, (((1,), (1,)), ((), ())),
                                preferred_element_type=jnp.float32)  # (tq, tk)
            p = (s * row_scale) * col_scale                          # f32
            if on_diagonal:
                p = jnp.where(causal, p, 0.0)
            den_acc[h] = den_acc[h] + jnp.sum(p, axis=-1, keepdims=True)
            num_acc[h] = num_acc[h] + jnp.dot(
                p.astype(jnp.bfloat16), v_h, preferred_element_type=jnp.float32)

    # Strictly-below-diagonal tiles: decay scaling only (no compare/select).
    @pl.when(ki < qi)
    def _():
        accumulate(on_diagonal=False)

    # Diagonal tile: apply the causal mask.
    @pl.when(ki == qi)
    def _():
        accumulate(on_diagonal=True)

    # (ki > qi tiles do nothing; their k/v index maps are clamped so no DMA.)

    @pl.when(ki == nk - 1)
    def _():
        for h in range(num_heads):
            den = jnp.maximum(jnp.abs(den_acc[h]), 1.0)              # (tq, 1)
            o_h = num_acc[h] * pl.reciprocal(den, approx=False)      # (tq, Dv)
            # group_norm: RMSNorm over head_dim, no affine.
            rms = lax.rsqrt(jnp.mean(o_h * o_h, axis=-1, keepdims=True) + eps)
            out_buf[:, h * head_dim:(h + 1) * head_dim] = o_h * rms
        gated = jax.nn.silu(g_ref[0].astype(jnp.float32)) * out_buf[...]
        o_ref[0] = jnp.dot(gated.astype(jnp.bfloat16), wo_ref[...],
                           preferred_element_type=jnp.float32)


# ---------------------------------------------------------------------------
# Wrapper
# ---------------------------------------------------------------------------
def multiscale_retention(x, wq, wk, wv, wg, wo, decay, *, num_heads, eps=1e-6,
                         seq_tile_cap=256):
    """x: (B, T, E) f32.  Weights are (in, out).  decay: per-head log-gammas (H,)."""
    bsz, tgt_len, embed_dim = x.shape
    value_dim = wv.shape[1]
    key_dim = embed_dim // num_heads
    head_dim = value_dim // num_heads
    scaling = float(key_dim) ** -0.5
    decay = tuple(float(d) for d in decay)
    assert len(decay) == num_heads

    tile = _pick_tile(tgt_len, seq_tile_cap)
    n_tiles = tgt_len // tile

    # bf16 operands for the MXU; accumulation stays f32 inside the kernels.
    x_b = x.astype(jnp.bfloat16)
    wq_b = wq.astype(jnp.bfloat16)
    wk_b = (wk * scaling).astype(jnp.bfloat16)       # key scaling folded into Wk
    wv_b = wv.astype(jnp.bfloat16)
    wg_b = wg.astype(jnp.bfloat16)
    wo_b = wo.astype(jnp.bfloat16)

    vmem_lim = 48 * 1024 * 1024   # headroom on v7x's 64 MiB physical VMEM

    # --- Kernel A: projections ---
    qh, kh, vh, g = pl.pallas_call(
        functools.partial(_proj_kernel, num_heads=num_heads,
                          key_dim=key_dim, head_dim=head_dim),
        grid=(bsz, n_tiles),
        in_specs=[
            pl.BlockSpec((1, tile, embed_dim), lambda b, r: (b, r, 0)),
            pl.BlockSpec((embed_dim, embed_dim), lambda b, r: (0, 0)),
            pl.BlockSpec((embed_dim, embed_dim), lambda b, r: (0, 0)),
            pl.BlockSpec((embed_dim, value_dim), lambda b, r: (0, 0)),
            pl.BlockSpec((embed_dim, value_dim), lambda b, r: (0, 0)),
        ],
        out_specs=(
            pl.BlockSpec((1, num_heads, tile, key_dim), lambda b, r: (b, 0, r, 0)),
            pl.BlockSpec((1, num_heads, tile, key_dim), lambda b, r: (b, 0, r, 0)),
            pl.BlockSpec((1, num_heads, tile, head_dim), lambda b, r: (b, 0, r, 0)),
            pl.BlockSpec((1, tile, value_dim), lambda b, r: (b, r, 0)),
        ),
        out_shape=(
            jax.ShapeDtypeStruct((bsz, num_heads, tgt_len, key_dim), jnp.bfloat16),
            jax.ShapeDtypeStruct((bsz, num_heads, tgt_len, key_dim), jnp.bfloat16),
            jax.ShapeDtypeStruct((bsz, num_heads, tgt_len, head_dim), jnp.bfloat16),
            jax.ShapeDtypeStruct((bsz, tgt_len, value_dim), jnp.bfloat16),
        ),
        compiler_params=pltpu.CompilerParams(
            dimension_semantics=("parallel", "parallel"),
            vmem_limit_bytes=vmem_lim),
    )(x_b, wq_b, wk_b, wv_b, wg_b)

    # --- Kernel B: tiled retention + epilogue ---
    out = pl.pallas_call(
        functools.partial(_retention_kernel, decay=decay, tq=tile, tk=tile,
                          head_dim=head_dim, eps=eps),
        grid=(bsz, n_tiles, n_tiles),
        in_specs=[
            pl.BlockSpec((1, num_heads, tile, key_dim),
                         lambda b, qi, ki: (b, 0, qi, 0)),
            # Clamp to min(ki, qi): above-diagonal steps re-reference the
            # previous block -> no new k/v DMA for causally-skipped tiles.
            pl.BlockSpec((1, num_heads, tile, key_dim),
                         lambda b, qi, ki: (b, 0, jnp.minimum(ki, qi), 0)),
            pl.BlockSpec((1, num_heads, tile, head_dim),
                         lambda b, qi, ki: (b, 0, jnp.minimum(ki, qi), 0)),
            pl.BlockSpec((1, tile, value_dim), lambda b, qi, ki: (b, qi, 0)),
            pl.BlockSpec((value_dim, embed_dim), lambda b, qi, ki: (0, 0)),
        ],
        out_specs=pl.BlockSpec((1, tile, embed_dim), lambda b, qi, ki: (b, qi, 0)),
        out_shape=jax.ShapeDtypeStruct((bsz, tgt_len, embed_dim), jnp.float32),
        scratch_shapes=[
            pltpu.VMEM((num_heads, tile, head_dim), jnp.float32),   # num accumulator
            pltpu.VMEM((num_heads, tile, 1), jnp.float32),          # den accumulator
            pltpu.VMEM((tile, value_dim), jnp.float32),             # head-assembly buf
        ],
        compiler_params=pltpu.CompilerParams(
            dimension_semantics=("parallel", "parallel", "arbitrary"),
            vmem_limit_bytes=vmem_lim),
    )(qh, kh, vh, g, wo_b)
    return out


# ---------------------------------------------------------------------------
# Pure-JAX reference + test
# ---------------------------------------------------------------------------
def _xavier_uniform(key, shape, gain):
    fan_in, fan_out = shape
    bound = gain * (6.0 / (fan_in + fan_out)) ** 0.5
    return jax.random.uniform(key, shape, jnp.float32, -bound, bound)


def _reference(x, wq, wk, wv, wg, wo, mask, *, num_heads, eps=1e-6):
    """Pure-JAX f32 reference mirroring the PyTorch parallel_forward path."""
    bsz, t, e = x.shape
    vdim = wv.shape[1]
    kd, hd = e // num_heads, vdim // num_heads
    q = x @ wq
    k = (x @ wk) * (kd ** -0.5)
    v = x @ wv
    g = x @ wg
    q = q.reshape(bsz, t, num_heads, kd).transpose(0, 2, 1, 3)
    k = k.reshape(bsz, t, num_heads, kd).transpose(0, 2, 1, 3)
    vr = v.reshape(bsz, t, num_heads, hd).transpose(0, 2, 1, 3)
    qk = jnp.einsum('bhqd,bhkd->bhqk', q, k) * mask[None]
    qk = qk / jnp.clip(jnp.abs(qk.sum(-1, keepdims=True)), 1.0, None)
    out = jnp.einsum('bhqk,bhkd->bhqd', qk, vr).transpose(0, 2, 1, 3)
    out = out * jax.lax.rsqrt(jnp.mean(out * out, -1, keepdims=True) + eps)
    out = out.reshape(bsz, t, vdim)
    out = jax.nn.silu(g) * out
    return out @ wo


if __name__ == "__main__":
    bsz, tgt_len = 2, 16
    embed_dim, value_dim, num_heads = 32, 64, 4
    eps = 1e-6

    key = jax.random.PRNGKey(0)
    kx, kq, kk, kv, kg, ko = jax.random.split(key, 6)

    x = jax.random.normal(kx, (bsz, tgt_len, embed_dim), jnp.float32)

    gain = 2.0 ** -2.5
    # weights stored as (in_features, out_features), i.e. PyTorch weight^T
    wq = _xavier_uniform(kq, (embed_dim, embed_dim), gain)
    wk = _xavier_uniform(kk, (embed_dim, embed_dim), gain)
    wv = _xavier_uniform(kv, (embed_dim, value_dim), gain)
    wg = _xavier_uniform(kg, (embed_dim, value_dim), gain)
    wo = _xavier_uniform(ko, (value_dim, embed_dim), 1.0)

    # RetNet per-head decay scalars; the kernel rebuilds the (normalized) decay
    # mask tile-by-tile from these, so no dense (H, T, T) array is passed in.
    decay = jnp.log(1.0 - 2.0 ** (-5.0 - jnp.arange(num_heads, dtype=jnp.float32)))

    # Dense mask (RetNet rel_pos style) used only by the pure-JAX reference.
    idx = jnp.arange(tgt_len, dtype=jnp.float32)
    diff = idx[:, None] - idx[None, :]
    mask = jnp.where(diff[None] >= 0,
                     jnp.exp(decay[:, None, None] * diff[None]), 0.0)
    mask = jnp.nan_to_num(mask)
    mask = mask / jnp.sqrt(jnp.sum(mask, axis=-1, keepdims=True))
    mask = jnp.nan_to_num(mask).astype(jnp.float32)
    # (sin, cos) from rel_pos are unpacked but unused in the reference forward(),
    # so no rotary/theta-shift is applied here either.

    out = multiscale_retention(x, wq, wk, wv, wg, wo, decay,
                               num_heads=num_heads, eps=eps)
    out = jax.block_until_ready(out)

    ref = _reference(x, wq, wk, wv, wg, wo, mask, num_heads=num_heads, eps=eps)
    assert out.shape == (bsz, tgt_len, embed_dim)
    # bf16 MXU operands (f32 accumulation) -> loosened tolerance vs f32 reference.
    assert jnp.allclose(out, ref, rtol=5e-2, atol=5e-2), "mismatch vs reference"

    print("KERNEL_OK")
</pallas_src>

<mosaic_0001>
module attributes {stable_mosaic.version = 11 : i64} {
  func.func @_proj_kernel(%arg0: i32, %arg1: i32, %arg2: memref<1x16x32xbf16, #tpu.memory_space<vmem>>, %arg3: memref<32x32xbf16, #tpu.memory_space<vmem>>, %arg4: memref<32x32xbf16, #tpu.memory_space<vmem>>, %arg5: memref<32x64xbf16, #tpu.memory_space<vmem>>, %arg6: memref<32x64xbf16, #tpu.memory_space<vmem>>, %arg7: memref<1x4x16x8xbf16, #tpu.memory_space<vmem>>, %arg8: memref<1x4x16x8xbf16, #tpu.memory_space<vmem>>, %arg9: memref<1x4x16x16xbf16, #tpu.memory_space<vmem>>, %arg10: memref<1x16x64xbf16, #tpu.memory_space<vmem>>) attributes {dimension_semantics = [#tpu.dimension_semantics<parallel>, #tpu.dimension_semantics<parallel>], iteration_bounds = array<i64: 2, 1>, scalar_prefetch = 0 : i64, scratch_operands = 0 : i64, tpu.core_type = #tpu.core_type<tc>, window_params = [{transform_indices = @transform_0, window_bounds = array<i64: 1, 16, 32>}, {pipeline_mode = #tpu.pipeline_mode<synchronous>, transform_indices = @transform_1, window_bounds = array<i64: 32, 32>}, {pipeline_mode = #tpu.pipeline_mode<synchronous>, transform_indices = @transform_2, window_bounds = array<i64: 32, 32>}, {pipeline_mode = #tpu.pipeline_mode<synchronous>, transform_indices = @transform_3, window_bounds = array<i64: 32, 64>}, {pipeline_mode = #tpu.pipeline_mode<synchronous>, transform_indices = @transform_4, window_bounds = array<i64: 32, 64>}, {transform_indices = @transform_5, window_bounds = array<i64: 1, 4, 16, 8>}, {transform_indices = @transform_6, window_bounds = array<i64: 1, 4, 16, 8>}, {transform_indices = @transform_7, window_bounds = array<i64: 1, 4, 16, 16>}, {transform_indices = @transform_8, window_bounds = array<i64: 1, 16, 64>}]} {
    %c0 = arith.constant 0 : index
    %c0_0 = arith.constant 0 : index
    %c0_1 = arith.constant 0 : index
    %0 = vector.load %arg2[%c0, %c0_0, %c0_1] : memref<1x16x32xbf16, #tpu.memory_space<vmem>>, vector<1x16x32xbf16>
    %1 = vector.shape_cast %0 : vector<1x16x32xbf16> to vector<16x32xbf16>
    %c0_2 = arith.constant 0 : index
    %c0_3 = arith.constant 0 : index
    %2 = vector.load %arg3[%c0_2, %c0_3] : memref<32x32xbf16, #tpu.memory_space<vmem>>, vector<32x32xbf16>
    %cst = arith.constant dense<0.000000e+00> : vector<16x32xf32>
    %3 = tpu.matmul %1, %2, %cst {dimension_numbers = #tpu.dot_dimension_numbers<[1], [0], [0], [1], [0, 0, 1, 1], [], []>} : vector<16x32xbf16>, vector<32x32xbf16>, vector<16x32xf32> -> vector<16x32xf32>
    %c0_4 = arith.constant 0 : index
    %c0_5 = arith.constant 0 : index
    %4 = vector.load %arg4[%c0_4, %c0_5] : memref<32x32xbf16, #tpu.memory_space<vmem>>, vector<32x32xbf16>
    %cst_6 = arith.constant dense<0.000000e+00> : vector<16x32xf32>
    %5 = tpu.matmul %1, %4, %cst_6 {dimension_numbers = #tpu.dot_dimension_numbers<[1], [0], [0], [1], [0, 0, 1, 1], [], []>} : vector<16x32xbf16>, vector<32x32xbf16>, vector<16x32xf32> -> vector<16x32xf32>
    %c0_7 = arith.constant 0 : index
    %c0_8 = arith.constant 0 : index
    %6 = vector.load %arg5[%c0_7, %c0_8] : memref<32x64xbf16, #tpu.memory_space<vmem>>, vector<32x64xbf16>
    %cst_9 = arith.constant dense<0.000000e+00> : vector<16x64xf32>
    %7 = tpu.matmul %1, %6, %cst_9 {dimension_numbers = #tpu.dot_dimension_numbers<[1], [0], [0], [1], [0, 0, 1, 1], [], []>} : vector<16x32xbf16>, vector<32x64xbf16>, vector<16x64xf32> -> vector<16x64xf32>
    %c0_10 = arith.constant 0 : index
    %c0_11 = arith.constant 0 : index
    %8 = vector.load %arg6[%c0_10, %c0_11] : memref<32x64xbf16, #tpu.memory_space<vmem>>, vector<32x64xbf16>
    %cst_12 = arith.constant dense<0.000000e+00> : vector<16x64xf32>
    %9 = tpu.matmul %1, %8, %cst_12 {dimension_numbers = #tpu.dot_dimension_numbers<[1], [0], [0], [1], [0, 0, 1, 1], [], []>} : vector<16x32xbf16>, vector<32x64xbf16>, vector<16x64xf32> -> vector<16x64xf32>
    %10 = vector.extract_strided_slice %3 {offsets = [0, 0], sizes = [16, 8], strides = [1, 1]} : vector<16x32xf32> to vector<16x8xf32>
    %11 = arith.truncf %10 : vector<16x8xf32> to vector<16x8xbf16>
    %c0_13 = arith.constant 0 : index
    %c0_14 = arith.constant 0 : index
    %c0_15 = arith.constant 0 : index
    %c0_16 = arith.constant 0 : index
    %12 = vector.load %arg7[%c0_13, %c0_14, %c0_15, %c0_16] : memref<1x4x16x8xbf16, #tpu.memory_space<vmem>>, vector<1x1x16x8xbf16>
    %13 = vector.shape_cast %12 : vector<1x1x16x8xbf16> to vector<16x8xbf16>
    %14 = vector.shape_cast %11 : vector<16x8xbf16> to vector<1x1x16x8xbf16>
    tpu.vector_store %arg7[%c0_13, %c0_14, %c0_15, %c0_16], %14 {strides = array<i32>} : memref<1x4x16x8xbf16, #tpu.memory_space<vmem>>, vector<1x1x16x8xbf16>,
    %15 = vector.extract_strided_slice %5 {offsets = [0, 0], sizes = [16, 8], strides = [1, 1]} : vector<16x32xf32> to vector<16x8xf32>
    %16 = arith.truncf %15 : vector<16x8xf32> to vector<16x8xbf16>
    %c0_17 = arith.constant 0 : index
    %c0_18 = arith.constant 0 : index
    %c0_19 = arith.constant 0 : index
    %c0_20 = arith.constant 0 : index
    %17 = vector.load %arg8[%c0_17, %c0_18, %c0_19, %c0_20] : memref<1x4x16x8xbf16, #tpu.memory_space<vmem>>, vector<1x1x16x8xbf16>
    %18 = vector.shape_cast %17 : vector<1x1x16x8xbf16> to vector<16x8xbf16>
    %19 = vector.shape_cast %16 : vector<16x8xbf16> to vector<1x1x16x8xbf16>
    tpu.vector_store %arg8[%c0_17, %c0_18, %c0_19, %c0_20], %19 {strides = array<i32>} : memref<1x4x16x8xbf16, #tpu.memory_space<vmem>>, vector<1x1x16x8xbf16>,
    %20 = vector.extract_strided_slice %7 {offsets = [0, 0], sizes = [16, 16], strides = [1, 1]} : vector<16x64xf32> to vector<16x16xf32>
    %21 = arith.truncf %20 : vector<16x16xf32> to vector<16x16xbf16>
    %c0_21 = arith.constant 0 : index
    %c0_22 = arith.constant 0 : index
    %c0_23 = arith.constant 0 : index
    %c0_24 = arith.constant 0 : index
    %22 = vector.load %arg9[%c0_21, %c0_22, %c0_23, %c0_24] : memref<1x4x16x16xbf16, #tpu.memory_space<vmem>>, vector<1x1x16x16xbf16>
    %23 = vector.shape_cast %22 : vector<1x1x16x16xbf16> to vector<16x16xbf16>
    %24 = vector.shape_cast %21 : vector<16x16xbf16> to vector<1x1x16x16xbf16>
    tpu.vector_store %arg9[%c0_21, %c0_22, %c0_23, %c0_24], %24 {strides = array<i32>} : memref<1x4x16x16xbf16, #tpu.memory_space<vmem>>, vector<1x1x16x16xbf16>,
    %25 = vector.extract_strided_slice %3 {offsets = [0, 8], sizes = [16, 8], strides = [1, 1]} : vector<16x32xf32> to vector<16x8xf32>
    %26 = arith.truncf %25 : vector<16x8xf32> to vector<16x8xbf16>
    %c0_25 = arith.constant 0 : index
    %c1 = arith.constant 1 : index
    %c0_26 = arith.constant 0 : index
    %c0_27 = arith.constant 0 : index
    %27 = vector.load %arg7[%c0_25, %c1, %c0_26, %c0_27] : memref<1x4x16x8xbf16, #tpu.memory_space<vmem>>, vector<1x1x16x8xbf16>
    %28 = vector.shape_cast %27 : vector<1x1x16x8xbf16> to vector<16x8xbf16>
    %29 = vector.shape_cast %26 : vector<16x8xbf16> to vector<1x1x16x8xbf16>
    tpu.vector_store %arg7[%c0_25, %c1, %c0_26, %c0_27], %29 {strides = array<i32>} : memref<1x4x16x8xbf16, #tpu.memory_space<vmem>>, vector<1x1x16x8xbf16>,
    %30 = vector.extract_strided_slice %5 {offsets = [0, 8], sizes = [16, 8], strides = [1, 1]} : vector<16x32xf32> to vector<16x8xf32>
    %31 = arith.truncf %30 : vector<16x8xf32> to vector<16x8xbf16>
    %c0_28 = arith.constant 0 : index
    %c1_29 = arith.constant 1 : index
    %c0_30 = arith.constant 0 : index
    %c0_31 = arith.constant 0 : index
    %32 = vector.load %arg8[%c0_28, %c1_29, %c0_30, %c0_31] : memref<1x4x16x8xbf16, #tpu.memory_space<vmem>>, vector<1x1x16x8xbf16>
    %33 = vector.shape_cast %32 : vector<1x1x16x8xbf16> to vector<16x8xbf16>
    %34 = vector.shape_cast %31 : vector<16x8xbf16> to vector<1x1x16x8xbf16>
    tpu.vector_store %arg8[%c0_28, %c1_29, %c0_30, %c0_31], %34 {strides = array<i32>} : memref<1x4x16x8xbf16, #tpu.memory_space<vmem>>, vector<1x1x16x8xbf16>,
    %35 = vector.extract_strided_slice %7 {offsets = [0, 16], sizes = [16, 16], strides = [1, 1]} : vector<16x64xf32> to vector<16x16xf32>
    %36 = arith.truncf %35 : vector<16x16xf32> to vector<16x16xbf16>
    %c0_32 = arith.constant 0 : index
    %c1_33 = arith.constant 1 : index
    %c0_34 = arith.constant 0 : index
    %c0_35 = arith.constant 0 : index
    %37 = vector.load %arg9[%c0_32, %c1_33, %c0_34, %c0_35] : memref<1x4x16x16xbf16, #tpu.memory_space<vmem>>, vector<1x1x16x16xbf16>
    %38 = vector.shape_cast %37 : vector<1x1x16x16xbf16> to vector<16x16xbf16>
    %39 = vector.shape_cast %36 : vector<16x16xbf16> to vector<1x1x16x16xbf16>
    tpu.vector_store %arg9[%c0_32, %c1_33, %c0_34, %c0_35], %39 {strides = array<i32>} : memref<1x4x16x16xbf16, #tpu.memory_space<vmem>>, vector<1x1x16x16xbf16>,
    %40 = vector.extract_strided_slice %3 {offsets = [0, 16], sizes = [16, 8], strides = [1, 1]} : vector<16x32xf32> to vector<16x8xf32>
    %41 = arith.truncf %40 : vector<16x8xf32> to vector<16x8xbf16>
    %c0_36 = arith.constant 0 : index
    %c2 = arith.constant 2 : index
    %c0_37 = arith.constant 0 : index
    %c0_38 = arith.constant 0 : index
    %42 = vector.load %arg7[%c0_36, %c2, %c0_37, %c0_38] : memref<1x4x16x8xbf16, #tpu.memory_space<vmem>>, vector<1x1x16x8xbf16>
    %43 = vector.shape_cast %42 : vector<1x1x16x8xbf16> to vector<16x8xbf16>
    %44 = vector.shape_cast %41 : vector<16x8xbf16> to vector<1x1x16x8xbf16>
    tpu.vector_store %arg7[%c0_36, %c2, %c0_37, %c0_38], %44 {strides = array<i32>} : memref<1x4x16x8xbf16, #tpu.memory_space<vmem>>, vector<1x1x16x8xbf16>,
    %45 = vector.extract_strided_slice %5 {offsets = [0, 16], sizes = [16, 8], strides = [1, 1]} : vector<16x32xf32> to vector<16x8xf32>
    %46 = arith.truncf %45 : vector<16x8xf32> to vector<16x8xbf16>
    %c0_39 = arith.constant 0 : index
    %c2_40 = arith.constant 2 : index
    %c0_41 = arith.constant 0 : index
    %c0_42 = arith.constant 0 : index
    %47 = vector.load %arg8[%c0_39, %c2_40, %c0_41, %c0_42] : memref<1x4x16x8xbf16, #tpu.memory_space<vmem>>, vector<1x1x16x8xbf16>
    %48 = vector.shape_cast %47 : vector<1x1x16x8xbf16> to vector<16x8xbf16>
    %49 = vector.shape_cast %46 : vector<16x8xbf16> to vector<1x1x16x8xbf16>
    tpu.vector_store %arg8[%c0_39, %c2_40, %c0_41, %c0_42], %49 {strides = array<i32>} : memref<1x4x16x8xbf16, #tpu.memory_space<vmem>>, vector<1x1x16x8xbf16>,
    %50 = vector.extract_strided_slice %7 {offsets = [0, 32], sizes = [16, 16], strides = [1, 1]} : vector<16x64xf32> to vector<16x16xf32>
    %51 = arith.truncf %50 : vector<16x16xf32> to vector<16x16xbf16>
    %c0_43 = arith.constant 0 : index
    %c2_44 = arith.constant 2 : index
    %c0_45 = arith.constant 0 : index
    %c0_46 = arith.constant 0 : index
    %52 = vector.load %arg9[%c0_43, %c2_44, %c0_45, %c0_46] : memref<1x4x16x16xbf16, #tpu.memory_space<vmem>>, vector<1x1x16x16xbf16>
    %53 = vector.shape_cast %52 : vector<1x1x16x16xbf16> to vector<16x16xbf16>
    %54 = vector.shape_cast %51 : vector<16x16xbf16> to vector<1x1x16x16xbf16>
    tpu.vector_store %arg9[%c0_43, %c2_44, %c0_45, %c0_46], %54 {strides = array<i32>} : memref<1x4x16x16xbf16, #tpu.memory_space<vmem>>, vector<1x1x16x16xbf16>,
    %55 = vector.extract_strided_slice %3 {offsets = [0, 24], sizes = [16, 8], strides = [1, 1]} : vector<16x32xf32> to vector<16x8xf32>
    %56 = arith.truncf %55 : vector<16x8xf32> to vector<16x8xbf16>
    %c0_47 = arith.constant 0 : index
    %c3 = arith.constant 3 : index
    %c0_48 = arith.constant 0 : index
    %c0_49 = arith.constant 0 : index
    %57 = vector.load %arg7[%c0_47, %c3, %c0_48, %c0_49] : memref<1x4x16x8xbf16, #tpu.memory_space<vmem>>, vector<1x1x16x8xbf16>
    %58 = vector.shape_cast %57 : vector<1x1x16x8xbf16> to vector<16x8xbf16>
    %59 = vector.shape_cast %56 : vector<16x8xbf16> to vector<1x1x16x8xbf16>
    tpu.vector_store %arg7[%c0_47, %c3, %c0_48, %c0_49], %59 {strides = array<i32>} : memref<1x4x16x8xbf16, #tpu.memory_space<vmem>>, vector<1x1x16x8xbf16>,
    %60 = vector.extract_strided_slice %5 {offsets = [0, 24], sizes = [16, 8], strides = [1, 1]} : vector<16x32xf32> to vector<16x8xf32>
    %61 = arith.truncf %60 : vector<16x8xf32> to vector<16x8xbf16>
    %c0_50 = arith.constant 0 : index
    %c3_51 = arith.constant 3 : index
    %c0_52 = arith.constant 0 : index
    %c0_53 = arith.constant 0 : index
    %62 = vector.load %arg8[%c0_50, %c3_51, %c0_52, %c0_53] : memref<1x4x16x8xbf16, #tpu.memory_space<vmem>>, vector<1x1x16x8xbf16>
    %63 = vector.shape_cast %62 : vector<1x1x16x8xbf16> to vector<16x8xbf16>
    %64 = vector.shape_cast %61 : vector<16x8xbf16> to vector<1x1x16x8xbf16>
    tpu.vector_store %arg8[%c0_50, %c3_51, %c0_52, %c0_53], %64 {strides = array<i32>} : memref<1x4x16x8xbf16, #tpu.memory_space<vmem>>, vector<1x1x16x8xbf16>,
    %65 = vector.extract_strided_slice %7 {offsets = [0, 48], sizes = [16, 16], strides = [1, 1]} : vector<16x64xf32> to vector<16x16xf32>
    %66 = arith.truncf %65 : vector<16x16xf32> to vector<16x16xbf16>
    %c0_54 = arith.constant 0 : index
    %c3_55 = arith.constant 3 : index
    %c0_56 = arith.constant 0 : index
    %c0_57 = arith.constant 0 : index
    %67 = vector.load %arg9[%c0_54, %c3_55, %c0_56, %c0_57] : memref<1x4x16x16xbf16, #tpu.memory_space<vmem>>, vector<1x1x16x16xbf16>
    %68 = vector.shape_cast %67 : vector<1x1x16x16xbf16> to vector<16x16xbf16>
    %69 = vector.shape_cast %66 : vector<16x16xbf16> to vector<1x1x16x16xbf16>
    tpu.vector_store %arg9[%c0_54, %c3_55, %c0_56, %c0_57], %69 {strides = array<i32>} : memref<1x4x16x16xbf16, #tpu.memory_space<vmem>>, vector<1x1x16x16xbf16>,
    %70 = arith.truncf %9 : vector<16x64xf32> to vector<16x64xbf16>
    %c0_58 = arith.constant 0 : index
    %c0_59 = arith.constant 0 : index
    %c0_60 = arith.constant 0 : index
    %71 = vector.load %arg10[%c0_58, %c0_59, %c0_60] : memref<1x16x64xbf16, #tpu.memory_space<vmem>>, vector<1x16x64xbf16>
    %72 = vector.shape_cast %71 : vector<1x16x64xbf16> to vector<16x64xbf16>
    %73 = vector.shape_cast %70 : vector<16x64xbf16> to vector<1x16x64xbf16>
    tpu.vector_store %arg10[%c0_58, %c0_59, %c0_60], %73 {strides = array<i32>} : memref<1x16x64xbf16, #tpu.memory_space<vmem>>, vector<1x16x64xbf16>,
    return
  }
  func.func @transform_0(%arg0: i32, %arg1: i32) -> (i32, i32, i32) {
    %c0_i32 = arith.constant 0 : i32
    %c0_i32_0 = arith.constant 0 : i32
    return %arg0, %arg1, %c0_i32 : i32, i32, i32
  }
  func.func @transform_1(%arg0: i32, %arg1: i32) -> (i32, i32) {
    %c0_i32 = arith.constant 0 : i32
    %c0_i32_0 = arith.constant 0 : i32
    %c0_i32_1 = arith.constant 0 : i32
    return %c0_i32, %c0_i32_0 : i32, i32
  }
  func.func @transform_2(%arg0: i32, %arg1: i32) -> (i32, i32) {
    %c0_i32 = arith.constant 0 : i32
    %c0_i32_0 = arith.constant 0 : i32
    %c0_i32_1 = arith.constant 0 : i32
    return %c0_i32, %c0_i32_0 : i32, i32
  }
  func.func @transform_3(%arg0: i32, %arg1: i32) -> (i32, i32) {
    %c0_i32 = arith.constant 0 : i32
    %c0_i32_0 = arith.constant 0 : i32
    %c0_i32_1 = arith.constant 0 : i32
    return %c0_i32, %c0_i32_0 : i32, i32
  }
  func.func @transform_4(%arg0: i32, %arg1: i32) -> (i32, i32) {
    %c0_i32 = arith.constant 0 : i32
    %c0_i32_0 = arith.constant 0 : i32
    %c0_i32_1 = arith.constant 0 : i32
    return %c0_i32, %c0_i32_0 : i32, i32
  }
  func.func @transform_5(%arg0: i32, %arg1: i32) -> (i32, i32, i32, i32) {
    %c0_i32 = arith.constant 0 : i32
    %c0_i32_0 = arith.constant 0 : i32
    %c0_i32_1 = arith.constant 0 : i32
    return %arg0, %c0_i32, %arg1, %c0_i32_0 : i32, i32, i32, i32
  }
  func.func @transform_6(%arg0: i32, %arg1: i32) -> (i32, i32, i32, i32) {
    %c0_i32 = arith.constant 0 : i32
    %c0_i32_0 = arith.constant 0 : i32
    %c0_i32_1 = arith.constant 0 : i32
    return %arg0, %c0_i32, %arg1, %c0_i32_0 : i32, i32, i32, i32
  }
  func.func @transform_7(%arg0: i32, %arg1: i32) -> (i32, i32, i32, i32) {
    %c0_i32 = arith.constant 0 : i32
    %c0_i32_0 = arith.constant 0 : i32
    %c0_i32_1 = arith.constant 0 : i32
    return %arg0, %c0_i32, %arg1, %c0_i32_0 : i32, i32, i32, i32
  }
  func.func @transform_8(%arg0: i32, %arg1: i32) -> (i32, i32, i32) {
    %c0_i32 = arith.constant 0 : i32
    %c0_i32_0 = arith.constant 0 : i32
    return %arg0, %arg1, %c0_i32 : i32, i32, i32
  }
}

</mosaic_0001>

<bundles_post_ra>
// kernel: tpu_custom_call.1
= control target key start
LH: loop header
LB: loop body
LE: loop exit
PB: predicated region body
PF: predicated region fallthrough
CT: control target
= control target key end

     0   :  { %s2162_s0 = inlined_call_operand.hbm [shape: bf16[2,16,32], index: 0, kind: input, shape index: {}]   ;;  %s2163_s1 = inlined_call_operand.hbm [shape: bf16[32,32], index: 1, kind: input, shape index: {}]   ;;  %s2164_s2 = inlined_call_operand.hbm [shape: bf16[32,32], index: 2, kind: input, shape index: {}]   ;;  %s2165_s3 = inlined_call_operand.hbm [shape: bf16[32,64], index: 3, kind: input, shape index: {}]   ;;  %s2166_s4 = inlined_call_operand.hbm [shape: bf16[32,64], index: 4, kind: input, shape index: {}]   ;;  %s2167_s5 = inlined_call_operand.vmem [shape: bf16[2,4,16,8], index: 5, kind: output, shape index: {0}]   ;;  %s2168_s6 = inlined_call_operand.vmem [shape: bf16[2,4,16,8], index: 6, kind: output, shape index: {1}]   ;;  %s2169_s7 = inlined_call_operand.hbm [shape: bf16[2,4,16,16], index: 7, kind: output, shape index: {2}]   ;;  %s2170_s8 = inlined_call_operand.hbm [shape: bf16[2,16,64], index: 8, kind: output, shape index: {3}]  }
   0x1   :  { %2183 = sst [smem:[#allocation21_spill]] %s2168_s6 }
   0x2   :  { %2184 = sst [smem:[#allocation22_spill]] %s2169_s7 }
   0x3   :  { %2185 = sst [smem:[#allocation23_spill]] %s2170_s8 }
   0x4   :  { %14 = vsyncpa [#allocation3], 0 }
   0x5   :  { %16 = vsyncpa [#allocation3 + $0x1], 0 }
   0x6   :  { %17 = vsyncpa [#allocation6], 0 }
   0x7   :  { %18 = vsyncpa [#allocation9], 0 }
   0x8   :  { %19 = vsyncpa [#allocation4], 0 }
   0x9   :  { %21 = vsyncpa [#allocation4 + $0x1], 0 }
   0xa   :  { %22 = vsyncpa [#allocation13], 0 }
   0xb   :  { %24 = vsyncpa [#allocation13 + $0x1], 0  ;;  %s1709_s27 = smov 0   ;;  %s1711_s28 = smov 0  }
   0xc   :  { %s1713_s29 = smov 0   ;;  %s1715_s30 = smov 0  }
   0xd   :  { %s1717_s9 = smov 0   ;;  %s1719_s10 = smov 0  }
   0xe LB: > { %2186 = sst [smem:[#allocation19_spill]] %s1624_s27  ;;  %s1125_s11 = sadd.s32 4294967295, %s1644_s10   ;;  %s1644_s10 = sphi %s1719_s10, %s30_s10   ;;  %s1640_s9 = sphi %s1717_s9, %s2215_s9   ;;  %s1636_s30 = sphi %s1715_s30, %s2214_s30   ;;  %s1632_s29 = sphi %s1713_s29, %s2213_s29   ;;  %s1628_s28 = sphi %s1711_s28, %s2212_s28   ;;  %s1624_s27 = sphi %s1709_s27, %s2211_s27  }
   0xf   : > { %s1126_s12 = sadd.s32 4294967294, %s1644_s10   ;;  %p64_p0 = scmp.ne.s32.totalorder %s1628_s28, %s1624_s27 }
  0x10   : > { %p1743_p1 = scmp.eq.s32.totalorder %s1125_s11, 0  ;;  %p1747_p2 = scmp.eq.s32.totalorder %s1125_s11, 1 }
  0x11   : > { %p236_p3 = scmp.eq.s32.totalorder %s1126_s12, 1  ;;  %p1127_p5 = scmp.ge.s32.totalorder %s1644_s10, 1 }
  0x12   : > { %s2187_s13 = scalar_select %p1743_p1, 1, 0 }
  0x13   : > { %s2188_s14 = scalar_select %p1747_p2, 1, 0 }
  0x14   : > { %p1753_p4 = por %p1743_p1, %p64_p0  ;;  %p1758_p6 = por %p236_p3, %p64_p0 }
  0x15   : > { %p271_p7 = scmp.lt.s32.totalorder %s1644_s10, 3  ;;  %s1646_s18 = smov [#allocation5]  }
  0x16   : > { %s2189_s15 = scalar_select %p1753_p4, 1, 0 }
  0x17   : > { %s2190_s16 = scalar_select %p1758_p6, 1, 0 }
  0x18   : > { %p1763_p8 = pnand %p1127_p5, %p271_p7  ;;  %s283_s19 = sshll.u32 %s1646_s18, 4  ;;  %s1767_s19 = int_to_ptr.vmem [resolvable:$true] %s283_s19 }
  0x19   : > { %2191 = sst [smem:[#allocation20_spill]] %s2190_s16  ;;  %s1647_s21 = smov [#allocation8]  }
  0x1a   : > { %s2192_s17 = scalar_select %p1763_p8, 1, 0 }
  0x1b   : > { %p1274_p9 = pneg %p1763_p8  ;;  %s309_s22 = sshll.u32 %s1647_s21, 4  ;;  %s1778_s22 = int_to_ptr.vmem [resolvable:$true] %s309_s22 }
  0x1c   : > { %s1648_s23 = smov [#allocation7]   ;;  %s1380_s11 = scalar_lea.hbm %s2163_s1, 256 }
  0x1d   : > { %p1774_p11 = pnand %p1274_p9, %p1743_p1  ;;  %s1780_s24 = sshll.u32 %s1648_s23, 4  ;;  %s297_s24 = int_to_ptr.vmem [resolvable:$true] %s1780_s24 }
  0x1e   : > { %p1381_p12 = scmp.ne.s32.totalorder %s2163_s1, %s1380_s11  ;;  %p1387_p5 = scmp.lt.u32.totalorder %s1380_s11, %s2163_s1 }
  0x1f   : > { %p1790_p13 = pneg %p1774_p11 }
  0x21   : > { %p1383_p0 = pnand %p1790_p13, %p1381_p12 }
  0x23   : > { %p1384_p3 = pneg %p1383_p0 }
  0x25   : > { %p1389_p7 = pnand %p1387_p5, %p1384_p3 }
  0x27   : > { %1392 = shalt.err (!%p1389_p7)
}
  0x28   : > { %s1393_s25 = scalar_lea.vmem %s1767_s19, 256  ;;  %p1401_p1 = scmp.lt.s32.totalorder %s1767_s19, %s1767_s19 }
  0x29   : > { %p1394_p9 = scmp.ne.s32.totalorder %s1767_s19, %s1393_s25  ;;  %p1402_p4 = scmp.lt.s32.totalorder %s1393_s25, %s1393_s25 }
  0x2b   : > { %p1396_p10 = pnand %p1394_p9, %p1790_p13  ;;  %p1403_p12 = por %p1402_p4, %p1401_p1 }
  0x2d   : > { %p1397_p6 = pneg %p1396_p10 }
  0x2f   : > { %p1404_p0 = pnand %p1403_p12, %p1397_p6 }
  0x31   : > { %1407 = shalt.err (!%p1404_p0)
}
  0x32   : > { %s1649_s26 = smov 64   ;;  %s1650_s11 = smov 4  }
  0x33   : > { %1277 = dma.hbm_to_vmem [thread:$0]  (!%p1774_p11), %s2163_s1, 256, %s1767_s19, [#allocation6], %s1649_s26, %s1649_s26, %s1650_s11  }
  0x34   : > { %s1408_s25 = scalar_lea.hbm %s2165_s3, 256 }
  0x35   : > { %p1409_p1 = scmp.ne.s32.totalorder %s2165_s3, %s1408_s25  ;;  %p1415_p10 = scmp.lt.u32.totalorder %s1408_s25, %s2165_s3 }
  0x37   : > { %p1411_p4 = pnand %p1409_p1, %p1790_p13 }
  0x39   : > { %p1412_p6 = pneg %p1411_p4 }
  0x3b   : > { %p1417_p3 = pnand %p1415_p10, %p1412_p6 }
  0x3d   : > { %1420 = shalt.err (!%p1417_p3)
}
  0x3e   : > { %s1421_s19 = scalar_lea.vmem %s1778_s22, 256  ;;  %p1429_p12 = scmp.lt.s32.totalorder %s1778_s22, %s1778_s22 }
  0x3f   : > { %p1422_p5 = scmp.ne.s32.totalorder %s1778_s22, %s1421_s19  ;;  %p1430_p0 = scmp.lt.s32.totalorder %s1421_s19, %s1421_s19 }
  0x41   : > { %p1424_p7 = pnand %p1422_p5, %p1790_p13  ;;  %p1431_p1 = por %p1430_p0, %p1429_p12 }
  0x43   : > { %p1425_p9 = pneg %p1424_p7 }
  0x45   : > { %p1432_p4 = pnand %p1431_p1, %p1425_p9 }
  0x47   : > { %1435 = shalt.err (!%p1432_p4)
}
  0x48   : > { %1283 = dma.hbm_to_vmem [thread:$0]  (!%p1774_p11), %s2165_s3, 256, %s1778_s22, [#allocation9], %s1649_s26, %s1649_s26, %s1650_s11  }
  0x49   : > { %s1436_s12 = scalar_lea.hbm %s2164_s2, 256 }
  0x4a   : > { %p1437_p6 = scmp.ne.s32.totalorder %s2164_s2, %s1436_s12  ;;  %p1443_p5 = scmp.lt.u32.totalorder %s1436_s12, %s2164_s2 }
  0x4c   : > { %p1439_p10 = pnand %p1437_p6, %p1790_p13 }
  0x4e   : > { %p1440_p3 = pneg %p1439_p10 }
  0x50   : > { %p1445_p7 = pnand %p1443_p5, %p1440_p3 }
  0x52   : > { %1448 = shalt.err (!%p1445_p7)
}
  0x53   : > { %s1449_s19 = scalar_lea.vmem %s297_s24, 256  ;;  %p1457_p1 = scmp.lt.s32.totalorder %s297_s24, %s297_s24 }
  0x54   : > { %p1450_p9 = scmp.ne.s32.totalorder %s297_s24, %s1449_s19  ;;  %p1458_p4 = scmp.lt.s32.totalorder %s1449_s19, %s1449_s19 }
  0x56   : > { %p1452_p12 = pnand %p1450_p9, %p1790_p13  ;;  %p1459_p8 = por %p1458_p4, %p1457_p1 }
  0x58   : > { %p1453_p0 = pneg %p1452_p12 }
  0x5a   : > { %p1460_p2 = pnand %p1459_p8, %p1453_p0 }
  0x5c   : > { %1463 = shalt.err (!%p1460_p2)
}
  0x5d   : > { %1280 = dma.hbm_to_vmem [thread:$0]  (!%p1774_p11), %s2164_s2, 256, %s297_s24, [#allocation6], %s1649_s26, %s1649_s26, %s1650_s11  }
  0x5e   : > { %s1651_s7 = smov [#allocation10]   ;;  %s1464_s18 = scalar_lea.hbm %s2166_s4, 256 }
  0x5f   : > { %s322_s8 = sshll.u32 %s1651_s7, 4  ;;  %p1465_p2 = scmp.ne.s32.totalorder %s2166_s4, %s1464_s18  ;;  %s323_s8 = int_to_ptr.vmem [resolvable:$true] %s322_s8 }
  0x60   : > { %p1471_p10 = scmp.lt.u32.totalorder %s1464_s18, %s2166_s4 }
  0x61   : > { %p1467_p8 = pnand %p1465_p2, %p1790_p13 }
  0x63   : > { %p1468_p6 = pneg %p1467_p8 }
  0x65   : > { %p1473_p3 = pnand %p1471_p10, %p1468_p6 }
  0x67   : > { %1476 = shalt.err (!%p1473_p3)
}
  0x68   : > { %s1477_s24 = scalar_lea.vmem %s323_s8, 256  ;;  %p1485_p12 = scmp.lt.s32.totalorder %s323_s8, %s323_s8 }
  0x69   : > { %p1478_p5 = scmp.ne.s32.totalorder %s323_s8, %s1477_s24  ;;  %p1486_p0 = scmp.lt.s32.totalorder %s1477_s24, %s1477_s24 }
  0x6b   : > { %p1480_p7 = pnand %p1478_p5, %p1790_p13  ;;  %p1487_p1 = por %p1486_p0, %p1485_p12 }
  0x6d   : > { %p1481_p9 = pneg %p1480_p7 }
  0x6f   : > { %p1488_p4 = pnand %p1487_p1, %p1481_p9 }
  0x71   : > { %1491 = shalt.err (!%p1488_p4)
}
  0x72   : > { %1286 = dma.hbm_to_vmem [thread:$0]  (!%p1774_p11), %s2166_s4, 256, %s323_s8, [#allocation9], %s1649_s26, %s1649_s26, %s1650_s11  }
  0x73   : > { %s42_s16 = sadd.s32 1, %s1640_s9  ;;  %s51_s20 = sadd.s32 1, %s1632_s29 }
  0x74   : > { %p44_p13 = scmp.ge.s32.totalorder %s42_s16, 2  ;;  %p58_p2 = scmp.ne.s32.totalorder %s1632_s29, %s1628_s28 }
  0x75   : > { %p59_p8 = scmp.eq.s32.totalorder %s1644_s10, 0  ;;  %p1302_p6 = scmp.lt.s32.totalorder %s1644_s10, 2 }
  0x76   : > { %s2217_s16 = smov (%p44_p13, %s42_s16), 0  ;;  %p2195_p3 = scmp.ne.s32.totalorder %s2188_s14, 0 }
  0x77   : > { %p60_p10 = por %p59_p8, %p58_p2  ;;  %s46_s27 = ssub.s32 %s1640_s9, %s2217_s16 }
  0x78   : > { %p1893_p5 = por %p2195_p3, %p58_p2  ;;  %s336_s12 = sand.u32 1, %s1632_s29  }
  0x79   : > { %p49_p7 = scmp.eq.s32.totalorder %s46_s27, 0  ;;  %s1133_s8 = sshll.u32 %s336_s12, 3 }
  0x7a   : > { %s1195_s18 = sshll.u32 %s1640_s9, 7  ;;  %s340_s14 = scalar_lea.vmem [#allocation2], %s1133_s8 }
  0x7b   : > { %s1902_s21 = scalar_select %p49_p7, %s1632_s29, %s51_s20  }
  0x7c   : > { %s1907_s19 = scalar_lea.hbm %s2162_s0, %s1195_s18  ;;  %s349_s24 = sshll.u32 %s340_s14, 4  ;;  %s1915_s24 = int_to_ptr.vmem [resolvable:$true] %s349_s24 }
  0x7d   : > { %p1911_p11 = pnand %p1302_p6, %p60_p10  ;;  %s1917_s6 = scalar_lea.sflag [#allocation3], %s336_s12 }
  0x7e   : > { %s1492_s20 = scalar_lea.hbm %s1907_s19, 128  ;;  %s1497_s18 = scalar_lea.hbm %s2162_s0, 256 }
  0x7f   : > { %p1493_p9 = scmp.ne.s32.totalorder %s1907_s19, %s1492_s20  ;;  %p1494_p12 = pneg %p1911_p11 }
  0x80   : > { %p1498_p4 = scmp.lt.u32.totalorder %s1907_s19, %s2162_s0  ;;  %p1499_p13 = scmp.lt.u32.totalorder %s1497_s18, %s1492_s20 }
  0x81   : > { %p1495_p0 = pnand %p1494_p12, %p1493_p9  ;;  %p1501_p8 = scmp.lt.u32.totalorder %s1492_s20, %s1907_s19 }
  0x82   : > { %p1500_p2 = por %p1499_p13, %p1498_p4 }
  0x83   : > { %p1496_p1 = pneg %p1495_p0 }
  0x84   : > { %p1502_p6 = por %p1501_p8, %p1500_p2 }
  0x86   : > { %p1503_p10 = pnand %p1502_p6, %p1496_p1 }
  0x88   : > { %1506 = shalt.err (!%p1503_p10)
}
  0x89   : > { %s1507_s12 = scalar_lea.vmem %s1915_s24, 128  ;;  %s1652_s14 = smov [#allocation2]  }
  0x8a   : > { %p1508_p3 = scmp.ne.s32.totalorder %s1915_s24, %s1507_s12  ;;  %s1512_s27 = sshll.u32 %s1652_s14, 4  ;;  %s1513_s27 = int_to_ptr.vmem [resolvable:$false] %s1512_s27 }
  0x8b   : > { %s1514_s8 = scalar_lea.vmem %s1513_s27, 256  ;;  %p1515_p0 = scmp.lt.s32.totalorder %s1915_s24, %s1513_s27 }
  0x8c   : > { %p1510_p7 = pnand %p1508_p3, %p1494_p12  ;;  %p1516_p4 = scmp.lt.s32.totalorder %s1514_s8, %s1507_s12 }
  0x8e   : > { %p1511_p9 = pneg %p1510_p7  ;;  %p1517_p13 = por %p1516_p4, %p1515_p0 }
  0x90   : > { %p1518_p2 = pnand %p1517_p13, %p1511_p9 }
  0x92   : > { %1521 = shalt.err (!%p1518_p2)
}
  0x93   : > { %1290 = dma.hbm_to_vmem [thread:$0]  (!%p1911_p11), %s1907_s19, 128, %s1915_s24, %s1917_s6, %s1649_s26, %s1649_s26, %s1650_s11  }
  0x94   : > { %p2198_p12 = scmp.ne.s32.totalorder %s2192_s17, 0 }
  0x95   : > { %s1951_s20 = sand.u32 (!%p2198_p12), 1, %s1628_s28   ;;  %p2199_p1 = scmp.ne.s32.totalorder (!%p2198_p12), %s2189_s15, 0 }
  0x96   : > { %361 = sbr.rel (%p2198_p12) target bundleno = 562 (0x232), region = 40  ;;  %s1137_s18 = sshll.u32 (!%p2198_p12), %s1951_s20, 3 }
  0x97   : > { %s364_s23 = scalar_lea.sflag (!%p2198_p12), [#allocation3], %s1951_s20  ;;  %s367_s22 = scalar_lea.vmem (!%p2198_p12), [#allocation2], %s1137_s18 }
  0x9d   : > { %1603 = dma.done.wait (%p2199_p1), %s364_s23, 128  }
  0x9e   : > { %1605 = vsyncadd (%p2199_p1), %s364_s23, 4294967168  ;;  %p2200_p11 = scmp.ne.s32.totalorder %s2187_s13, 0 }
  0xa0   : > { %1607 = dma.done.wait (%p2200_p11), [#allocation6], 512  }
  0xa1   : > { %1609 = vsyncadd (%p2200_p11), [#allocation6], 4294966784 }
  0xa2   : > { %1611 = dma.done.wait (%p2200_p11), [#allocation9], 512  }
  0xa3   : > { %1613 = vsyncadd (%p2200_p11), [#allocation9], 4294966784  ;;  %v1653_v0 = vmov 0.0   ;;  %vm1654_vm0 = vmmov 0   ;;  %v1371_v1 = vld [vmem:[#allocation5] sm:$0xff]   ;;  %v1372_v2 = vld [vmem:[#allocation7] sm:$0xff]  }
  0xa4   : > { %1220 = vmatprep.subr.bf16.mxu0 %v1653_v0  ;;  %1228 = vmatprep.subr.bf16.mxu1 %v1653_v0  ;;  %v1373_v3 = vld [vmem:[#allocation5 + $0x8] sm:$0xff]   ;;  %v1374_v4 = vld [vmem:[#allocation7 + $0x8] sm:$0xff]   ;;  %vm486_vm1 = vcmask 261120   ;;  %v1376_v6 = vld [vmem:[#allocation8] sm:$0xff]   ;;  %p441_p8 = scmp.lt.s32.totalorder %s1636_s30, 1  ;;  %vm710_vm2 = vcmask 60416  }
  0xa5   : > { %1224 = vmatprep.mubr.msk.bf16.mxu0 %vm1654_vm0, %v1653_v0  ;;  %1232 = vmatprep.mubr.msk.bf16.mxu1 %vm1654_vm0, %v1653_v0  ;;  %v1375_v5 = vld [vmem:[%s367_s22] sm:$0xff]   ;;  %v1377_v8 = vld [vmem:[#allocation8 + $0x8] sm:$0xff]   ;;  %s2201_s6 = sld [smem:[#allocation21_spill]]  ;;  %s1655_s12 = smov 120   ;;  %vm731_vm3 = vcmask 125952   ;;  %vm823_vm4 = vcmask 519168  }
  0xa6   : > { %1221 = vmatpush3.bf16.msra.mxu0 %v1371_v1  ;;  %1229 = vmatpush3.bf16.msra.mxu1 %v1372_v2  ;;  %v1378_v7 = vld [vmem:[#allocation10] sm:$0xff]   ;;  %v1379_v9 = vld [vmem:[#allocation10 + $0x8] sm:$0xff]   ;;  %s442_s13 = scalar_select %p441_p8, %s1636_s30, 1 }
  0xa7   : > { %1222 = vmatprep.subr.bf16.mxu0 %v1653_v0  ;;  %1230 = vmatprep.subr.bf16.mxu1 %v1653_v0  ;;  %s1142_s14 = sshll.u32 %s1951_s20, 5  ;;  %s2181_s27 = smov 112  }
  0xa8   : > { %s1196_s15 = sshll.u32 %s442_s13, 5  ;;  %s2007_s8 = scalar_lea.vmem [#allocation11], %s1142_s14 }
  0xa9   : > { %s1982_s11 = scalar_lea.vmem %s2167_s5, %s1196_s15  ;;  %s438_s23 = scalar_lea.vmem [#allocation12], %s1137_s18 }
  0xaa   : > { %1223 = vmatpush3.bf16.msra.mxu0 %v1373_v3  ;;  %1231 = vmatpush3.bf16.msra.mxu1 %v1374_v4  ;;  %s2179_s22 = smov 104   ;;  %s891_s13 = sshll.u32 %s438_s23, 4  ;;  %s2023_s13 = int_to_ptr.vmem [resolvable:$true] %s891_s13 }
  0xab   : > { %1236 = vmatprep.subr.bf16.mxu0 %v1653_v0  ;;  %1244 = vmatprep.subr.bf16.mxu1 %v1653_v0  ;;  %s1987_s25 = scalar_lea.vmem %s2201_s6, %s1196_s15  ;;  %s1658_s18 = smov 96  }
  0xac   : > { %s1207_s15 = sshll.u32 %s1636_s30, 7  ;;  %s2182_s17 = smov 80  }
  0xad   : > { %1225 = vmatmul.mubr.msk.bf16.vlgmr.msra.gmra.mrb[0].mxu0 %vm486_vm1, %v1375_v5  ;;  %1233 = vmatmul.mubr.msk.bf16.vlgmr.msra.gmra.mrb[0].mxu1 %vm486_vm1, %v1375_v5  ;;  %s2202_s24 = sld [smem:[#allocation23_spill]]  ;;  %s1522_s14 = scalar_lea.vmem %s2023_s13, 128 }
  0xae   : > { %1237 = vmatpush3.bf16.msra.mxu0 %v1376_v6  ;;  %1240 = vmatprep.mubr.msk.bf16.mxu0 %vm1654_vm0, %v1653_v0  ;;  %p1523_p6 = scmp.ne.s32.totalorder %s2023_s13, %s1522_s14 }
  0xaf   : > { %1238 = vmatprep.subr.bf16.mxu0 %v1653_v0  ;;  %1245 = vmatpush3.bf16.msra.mxu1 %v1378_v7 }
  0xb0   : > { %1248 = vmatprep.mubr.msk.bf16.mxu1 %vm1654_vm0, %v1653_v0  ;;  %1246 = vmatprep.subr.bf16.mxu1 %v1653_v0  ;;  %p1524_p10 = pnand %p1523_p6, %p1893_p5 }
  0xb2   : > { %1239 = vmatpush3.bf16.msra.mxu0 %v1377_v8  ;;  %p1525_p3 = pneg %p1524_p10 }
  0xb3   : > { %1247 = vmatpush3.bf16.msra.mxu1 %v1379_v9  ;;  %s2031_s6 = scalar_lea.hbm %s2202_s24, %s1207_s15 }
  0xb5   : > { %1241 = vmatmul.mubr.msk.bf16.vlgmr.msra.gmra.mrb[4].mxu0 %vm486_vm1, %v1375_v5 }
  0xb6   : > { %1249 = vmatmul.mubr.msk.bf16.vlgmr.msra.gmra.mrb[4].mxu1 %vm486_vm1, %v1375_v5 }
 0x180   : > { %v524_v10 = vpop.f32.mrb[0].mxu0  ;;  %v581_v13 = vpop.f32.mrb[0].mxu1 }
 0x181   : > { %v1198_v11 = vpack.c.bf16 %v524_v10, %v524_v10  ;;  %v1226_v12 = vpop.f32.mrb[1].mxu0  ;;  %v1989_v14 = vpack.c.bf16 %v581_v13, %v581_v13  ;;  %v1234_v16 = vpop.f32.mrb[1].mxu1 }
 0x182   : > { %v527_v15 = vpop.f32.mrb[2].mxu0  ;;  %v584_v18 = vpop.f32.mrb[2].mxu1 }
 0x183   : > { %711 = vst.msk [vmem:[%s1982_s11] sm:$0xf] %vm710_vm2, %v1198_v11  ;;  %v1199_v17 = vpack.c.bf16 %v527_v15, %v527_v15  ;;  %734 = vrot.lane.b32.xlu0 %v1198_v11, %s1655_s12  ;;  %v1227_v19 = vpop.f32.mrb[3].mxu0  ;;  %721 = vst.msk [vmem:[%s1987_s25] sm:$0xf] %vm710_vm2, %v1989_v14  ;;  %v1996_v20 = vpack.c.bf16 %v584_v18, %v584_v18  ;;  %v1235_v21 = vpop.f32.mrb[3].mxu1 }
 0x185   : > { %712 = vst.msk [vmem:[%s1982_s11 + $0x4] sm:$0xf] %vm710_vm2, %v1199_v17  ;;  %736 = vrot.lane.b32.xlu1 %v1199_v17, %s1655_s12  ;;  %722 = vst.msk [vmem:[%s1987_s25 + $0x4] sm:$0xf] %vm710_vm2, %v1996_v20 }
 0x187   : > { %743 = vrot.lane.b32.xlu0 %v1989_v14, %s1655_s12 }
 0x188   : > { %v638_v22 = vpop.f32.mrb[4].mxu0 }
 0x189   : > { %745 = vrot.lane.b32.xlu1 %v1996_v20, %s1655_s12  ;;  %v1202_v23 = vpack.c.bf16 %v638_v22, %v638_v22  ;;  %v1242_v24 = vpop.f32.mrb[5].mxu0  ;;  %v695_v28 = vpop.f32.mrb[4].mxu1  ;;  %s850_s12 = scalar_lea.sflag [#allocation13], %s1951_s20 }
 0x18a   : > { %v641_v25 = vpop.f32.mrb[6].mxu0  ;;  %v1204_v29 = vpack.c.bf16 %v695_v28, %v695_v28  ;;  %v1250_v30 = vpop.f32.mrb[5].mxu1 }
 0x18b   : > { %761 = vrot.lane.b32.xlu0 %v1198_v11, %s2181_s27  ;;  %732 = vst.msk [vmem:[%s2007_s8] sm:$0xf] %vm731_vm3, %v1202_v23  ;;  %v1203_v26 = vpack.c.bf16 %v641_v25, %v641_v25  ;;  %v1243_v27 = vpop.f32.mrb[7].mxu0  ;;  %v698_v31 = vpop.f32.mrb[6].mxu1 }
 0x18c   : > { %824 = vst.msk [vmem:[%s438_s23] sm:$0xf] %vm823_vm4, %v1204_v29  ;;  %v1205_v32 = vpack.c.bf16 %v698_v31, %v698_v31  ;;  %v1251_v33 = vpop.f32.mrb[7].mxu1 }
 0x18d   : > { %763 = vrot.lane.b32.xlu1 %v1199_v17, %s2181_s27  ;;  %733 = vst.msk [vmem:[%s2007_s8 + $0x4] sm:$0xf] %vm731_vm3, %v1203_v26 }
 0x18e   : > { %825 = vst.msk [vmem:[%s438_s23 + $0x4] sm:$0xf] %vm823_vm4, %v1205_v32  ;;  %s1660_s23 = smov [#allocation12]  }
 0x18f   : > { %770 = vrot.lane.b32.xlu0 %v1989_v14, %s2181_s27 }
 0x191   : > { %772 = vrot.lane.b32.xlu1 %v1996_v20, %s2181_s27 }
 0x193   : > { %788 = vrot.lane.b32.xlu0 %v1198_v11, %s2179_s22 }
 0x195   : > { %790 = vrot.lane.b32.xlu1 %v1199_v17, %s2179_s22  ;;  %s1526_s22 = sshll.u32 %s1660_s23, 4  ;;  %s1527_s22 = int_to_ptr.vmem [resolvable:$false] %s1526_s22 }
 0x196   : > { %p1529_p7 = scmp.lt.s32.totalorder %s2023_s13, %s1527_s22 }
 0x197   : > { %752 = vrot.lane.b32.xlu0 %v1202_v23, %s2181_s27  ;;  %s1528_s27 = scalar_lea.vmem %s1527_s22, 256 }
 0x198   : > { %p1530_p9 = scmp.lt.s32.totalorder %s1528_s27, %s1522_s14 }
 0x199   : > { %779 = vrot.lane.b32.xlu1 %v1202_v23, %s1658_s18 }
 0x19a   : > { %p1531_p0 = por %p1530_p9, %p1529_p7 }
 0x19b   : > { %806 = vrot.lane.b32.xlu0 %v1202_v23, %s2182_s17 }
 0x19c   : > { %p1532_p4 = pnand %p1531_p0, %p1525_p3 }
 0x19e   : > { %1535 = shalt.err (!%p1532_p4)
}
 0x19f   : > { %s1536_s15 = scalar_lea.hbm %s2031_s6, 128  ;;  %s1540_s23 = scalar_lea.hbm %s2202_s24, 256 }
 0x1a0   : > { %p1537_p13 = scmp.ne.s32.totalorder %s2031_s6, %s1536_s15  ;;  %p1541_p1 = scmp.lt.u32.totalorder %s2031_s6, %s2202_s24 }
 0x1a1   : > { %p1542_p11 = scmp.lt.u32.totalorder %s1540_s23, %s1536_s15  ;;  %p1544_p6 = scmp.lt.u32.totalorder %s1536_s15, %s2031_s6 }
 0x1a2   : > { %p1538_p2 = pnand %p1537_p13, %p1893_p5 }
 0x1a3   : > { %p1543_p8 = por %p1542_p11, %p1541_p1 }
 0x1a4   : > { %p1539_p12 = pneg %p1538_p2 }
 0x1a5   : > { %p1545_p10 = por %p1544_p6, %p1543_p8 }
 0x1a7   : > { %p1546_p3 = pnand %p1545_p10, %p1539_p12 }
 0x1a9   : > { %1549 = shalt.err (!%p1546_p3)
}
 0x1aa   : > { %s1661_s27 = smov 64   ;;  %s1662_s14 = smov 4   ;;  %781 = vrot.lane.b32.xlu1 %v1203_v26, %s1658_s18 }
 0x1ab   : > { %1271 = dma.vmem_to_hbm [thread:$0]  (%p1893_p5), %s2023_s13, 128, %s2031_s6, %s850_s12, %s1661_s27, %s1661_s27, %s1662_s14  }
 0x1ac   : > { %s2203_s17 = smov 112   ;;  %s2204_s15 = smov 80  }
 0x1ad   : > { %754 = vrot.lane.b32.xlu0 %v1203_v26, %s2203_s17  ;;  %s2205_s26 = smov 104   ;;  %s1206_s13 = sshll.u32 %s1636_s30, 9 }
 0x1ae   : > { %808 = vrot.lane.b32.xlu1 %v1203_v26, %s2204_s15  ;;  %s873_s18 = sshll.u32 %s2007_s8, 4  ;;  %s2206_s12 = sld [smem:[#allocation22_spill]]  ;;  %s2104_s18 = int_to_ptr.vmem [resolvable:$true] %s873_s18 }
 0x1af   : > { %s845_s30 = scalar_lea.sflag [#allocation4], %s1951_s20  ;;  %s1550_s23 = scalar_lea.vmem %s2104_s18, 512 }
 0x1b0   : > { %p1551_p7 = scmp.ne.s32.totalorder %s2104_s18, %s1550_s23  ;;  %s1663_s22 = smov [#allocation11]  }
 0x1b1   : > { %797 = vrot.lane.b32.xlu0 %v1989_v14, %s2205_s26  ;;  %s1554_s17 = sshll.u32 %s1663_s22, 4  ;;  %s1555_s17 = int_to_ptr.vmem [resolvable:$false] %s1554_s17 }
 0x1b2   : > { %799 = vrot.lane.b32.xlu1 %v1996_v20, %s2205_s26  ;;  %p1552_p9 = pnand %p1551_p7, %p1893_p5  ;;  %s1556_s15 = scalar_lea.vmem %s1555_s17, 1024 }
 0x1b3   : > { %p1557_p4 = scmp.lt.s32.totalorder %s2104_s18, %s1555_s17  ;;  %p1558_p13 = scmp.lt.s32.totalorder %s1556_s15, %s1550_s23 }
 0x1b4   : > { %s2102_s19 = scalar_lea.hbm %s2206_s12, %s1206_s13  ;;  %p1553_p0 = pneg %p1552_p9 }
 0x1b5   : > { %p1559_p2 = por %p1558_p13, %p1557_p4 }
 0x1b7   : > { %p1560_p12 = pnand %p1559_p2, %p1553_p0 }
 0x1f5   : > { %v735_v34 = vpop.permute.xlu0 %734 }
 0x1f6   : > { %1167 = vst.msk [vmem:[%s1982_s11 + $0x8] sm:$0xf] %vm710_vm2, %v735_v34 }
 0x1f7   : > { %v737_v35 = vpop.permute.xlu1 %736 }
 0x1f8   : > { %1168 = vst.msk [vmem:[%s1982_s11 + $0xc] sm:$0xf] %vm710_vm2, %v737_v35 }
 0x1f9   : > { %v744_v36 = vpop.permute.xlu0 %743 }
 0x1fa   : > { %1169 = vst.msk [vmem:[%s1987_s25 + $0x8] sm:$0xf] %vm710_vm2, %v744_v36 }
 0x1fb   : > { %v746_v37 = vpop.permute.xlu1 %745 }
 0x1fc   : > { %1170 = vst.msk [vmem:[%s1987_s25 + $0xc] sm:$0xf] %vm710_vm2, %v746_v37 }
 0x1fd   : > { %v762_v38 = vpop.permute.xlu0 %761 }
 0x1fe   : > { %1173 = vst.msk [vmem:[%s1982_s11 + $0x10] sm:$0xf] %vm710_vm2, %v762_v38 }
 0x1ff   : > { %v764_v39 = vpop.permute.xlu1 %763 }
 0x200   : > { %1174 = vst.msk [vmem:[%s1982_s11 + $0x14] sm:$0xf] %vm710_vm2, %v764_v39 }
 0x201   : > { %v771_v40 = vpop.permute.xlu0 %770 }
 0x202   : > { %1175 = vst.msk [vmem:[%s1987_s25 + $0x10] sm:$0xf] %vm710_vm2, %v771_v40 }
 0x203   : > { %v773_v41 = vpop.permute.xlu1 %772 }
 0x204   : > { %1176 = vst.msk [vmem:[%s1987_s25 + $0x14] sm:$0xf] %vm710_vm2, %v773_v41 }
 0x205   : > { %v789_v42 = vpop.permute.xlu0 %788 }
 0x206   : > { %1179 = vst.msk [vmem:[%s1982_s11 + $0x18] sm:$0xf] %vm710_vm2, %v789_v42 }
 0x207   : > { %v791_v43 = vpop.permute.xlu1 %790 }
 0x208   : > { %1180 = vst.msk [vmem:[%s1982_s11 + $0x1c] sm:$0xf] %vm710_vm2, %v791_v43 }
 0x209   : > { %v753_v44 = vpop.permute.xlu0 %752 }
 0x20a   : > { %1171 = vst.msk [vmem:[%s2007_s8 + $0x8] sm:$0xf] %vm731_vm3, %v753_v44 }
 0x20b   : > { %v780_v45 = vpop.permute.xlu1 %779 }
 0x20c   : > { %1177 = vst.msk [vmem:[%s2007_s8 + $0x10] sm:$0xf] %vm731_vm3, %v780_v45 }
 0x20d   : > { %v807_v46 = vpop.permute.xlu0 %806 }
 0x20e   : > { %1183 = vst.msk [vmem:[%s2007_s8 + $0x18] sm:$0xf] %vm731_vm3, %v807_v46 }
 0x21c   : > { %v782_v47 = vpop.permute.xlu1 %781 }
 0x21d   : > { %1178 = vst.msk [vmem:[%s2007_s8 + $0x14] sm:$0xf] %vm731_vm3, %v782_v47 }
 0x21f   : > { %v755_v48 = vpop.permute.xlu0 %754 }
 0x220   : > { %1172 = vst.msk [vmem:[%s2007_s8 + $0xc] sm:$0xf] %vm731_vm3, %v755_v48  ;;  %v809_v49 = vpop.permute.xlu1 %808 }
 0x221   : > { %1184 = vst.msk [vmem:[%s2007_s8 + $0x1c] sm:$0xf] %vm731_vm3, %v809_v49 }
 0x223   : > { %v798_v50 = vpop.permute.xlu0 %797 }
 0x224   : > { %1563 = shalt.err (!%p1560_p12)
}
 0x225   : > { %s1564_s8 = scalar_lea.hbm %s2102_s19, 512  ;;  %s1568_s11 = scalar_lea.hbm %s2206_s12, 1024 }
 0x226   : > { %p1565_p1 = scmp.ne.s32.totalorder %s2102_s19, %s1564_s8  ;;  %p1569_p6 = scmp.lt.u32.totalorder %s2102_s19, %s2206_s12 }
 0x227   : > { %p1570_p10 = scmp.lt.u32.totalorder %s1568_s11, %s1564_s8  ;;  %p1572_p7 = scmp.lt.u32.totalorder %s1564_s8, %s2102_s19 }
 0x228   : > { %p1566_p11 = pnand %p1565_p1, %p1893_p5 }
 0x229   : > { %p1571_p3 = por %p1570_p10, %p1569_p6 }
 0x22a   : > { %p1567_p8 = pneg %p1566_p11 }
 0x22b   : > { %p1573_p9 = por %p1572_p7, %p1571_p3 }
 0x22d   : > { %p1574_p0 = pnand %p1573_p9, %p1567_p8 }
 0x22f   : > { %1577 = shalt.err (!%p1574_p0)
}
 0x230   : > { %1270 = dma.vmem_to_hbm [thread:$0]  (%p1893_p5), %s2104_s18, 512, %s2102_s19, %s845_s30, %s1661_s27, %s1661_s27, %s1662_s14   ;;  %v800_v51 = vpop.permute.xlu1 %799 }
 0x231   : > { %1181 = vst.msk [vmem:[%s1987_s25 + $0x18] sm:$0xf] %vm710_vm2, %v798_v50  ;;  %1182 = vst.msk [vmem:[%s1987_s25 + $0x1c] sm:$0xf] %vm710_vm2, %v800_v51 }
 0x232 PF: > { %s2207_s23 = sld [smem:[#allocation19_spill]]  ;;  %s2208_s17 = sld [smem:[#allocation20_spill]] }
 0x233   : > { %p2210_p13 = scmp.ge.s32.totalorder %s1644_s10, 2 }
 0x238   : > { %s930_s7 = sand.u32 1, %s2207_s23   ;;  %p2209_p4 = scmp.ne.s32.totalorder %s2208_s17, 0 }
 0x239   : > { %s931_s15 = scalar_lea.sflag [#allocation4], %s930_s7 }
 0x23a   : > { %p1292_p2 = pnand %p2210_p13, %p2209_p4 }
 0x23c   : > { %1615 = dma.done.wait (!%p1292_p2), %s931_s15, 512  }
 0x23d   : > { %1617 = vsyncadd (!%p1292_p2), %s931_s15, 4294966784  ;;  %s940_s20 = scalar_lea.sflag [#allocation13], %s930_s7 }
 0x23e   : > { %1619 = dma.done.wait (!%p1292_p2), %s940_s20, 128  }
 0x23f   : > { %1621 = vsyncadd (!%p1292_p2), %s940_s20, 4294967168  ;;  %s30_s10 = sadd.s32 1, %s1644_s10   ;;  %s2211_s27 = smov %s1628_s28 }
 0x240   : > { %p27_p5 = scmp.ge.s32.totalorder %s30_s10, 4   ;;  %s2212_s28 = smov %s1632_s29 }
 0x241   : > { %s2213_s29 = smov %s1902_s21  ;;  %s2214_s30 = smov %s1640_s9 }
 0x242   : > { %s2215_s9 = smov %s2217_s16  ;;  %29 = sbr.rel (!%p27_p5) target bundleno = 14 (0xe), region = 151 }
 0x249   :  { %945 = vsyncpa [#allocation3], 1 }
 0x24a   :  { %947 = vsyncpa [#allocation3 + $0x1], 1 }
 0x24b   :  { %948 = vsyncpa [#allocation6], 1 }
 0x24c   :  { %949 = vsyncpa [#allocation9], 1 }
 0x24d   :  { %950 = vsyncpa [#allocation4], 1 }
 0x24e   :  { %952 = vsyncpa [#allocation4 + $0x1], 1 }
 0x24f   :  { %953 = vsyncpa [#allocation13], 1 }
 0x250   :  { %955 = vsyncpa [#allocation13 + $0x1], 1 }

</bundles_post_ra>
